<compile_context>
chip_gen: v7x
topology: tpu7x:2x2x1
jax: 0.10.0
libtpu: 0.0.40
codegen_flags: <defaults>
</compile_context>

<pallas_src>
import jax
import jax.numpy as jnp
from jax.experimental import pallas as pl
from jax.experimental.pallas import tpu as pltpu

LN_EPS = 1e-5  # torch.nn.LayerNorm default


def _patch_merging_kernel(x_ref, w_ev_ref, w_od_ref, bias_ref, out_ref):
    # x_ref:   (tile, 2, Wo, 2C) -- q=0 is the even image row of each 2x2 cell
    #          (channels [x0|x2]), q=1 the odd row ([x1|x3]).
    # w_*_ref: (2C, 2C_out) halves of the gamma-folded, permuted reduction
    #          weight.  bias_ref: (1, 2C_out) = beta @ W.
    # out_ref: (tile*Wo, 2C_out).
    tile, _, wo, c2 = x_ref.shape
    rows = tile * wo
    inv_n = 1.0 / (2.0 * c2)                 # 1 / (4*C) LayerNorm feature count

    xb = x_ref[...].astype(jnp.float32)      # one contiguous block load
    x_ev = xb[:, 0]                          # (tile, Wo, 2C); static slice
    x_od = xb[:, 1]

    # Two-pass (centered) LayerNorm statistics over the virtual 4C concat
    # [x_ev | x_od].  The centered values are needed for normalization anyway,
    # so this costs nothing extra vs. E[x^2] - mean^2 and is better
    # conditioned (addresses the one-pass cancellation concern).
    mean = (jnp.sum(x_ev, axis=-1, keepdims=True)
            + jnp.sum(x_od, axis=-1, keepdims=True)) * inv_n
    d_ev = x_ev - mean
    d_od = x_od - mean
    var = (jnp.sum(d_ev * d_ev, axis=-1, keepdims=True)
           + jnp.sum(d_od * d_od, axis=-1, keepdims=True)) * inv_n
    inv = jax.lax.rsqrt(var + LN_EPS)

    # Collapse to matmul shape only AFTER the (possibly bf16) cast so any
    # sublane relayout (Wo % 8 != 0) moves the narrow operand, not f32.
    mm_dtype = w_ev_ref.dtype
    xn_ev = (d_ev * inv).astype(mm_dtype).reshape(rows, c2)
    xn_od = (d_od * inv).astype(mm_dtype).reshape(rows, c2)

    acc = jnp.dot(xn_ev, w_ev_ref[...], preferred_element_type=jnp.float32)
    acc = acc + jnp.dot(xn_od, w_od_ref[...], preferred_element_type=jnp.float32)
    out_ref[...] = (acc + bias_ref[...]).astype(out_ref.dtype)


def prepare_patch_merging_params(gamma, beta, weight_t, *, matmul_dtype=None):
    """Fold the LayerNorm affine into the reduction weight and split it into
    the kernel's even-row / odd-row channel order.

    Call once at module init and reuse across forward calls (hoists weight
    traffic and several XLA ops out of the per-call path).

    gamma/beta: (4C,) LayerNorm affine.  weight_t: (4C, 2C) transposed
    nn.Linear weight.  matmul_dtype: MXU operand dtype; default bf16 (f32
    accumulation) for C >= 128, f32 otherwise -- the bf16 path changes
    numerics vs. PyTorch's f32 Linear by ~1e-3 relative.  On v5e pass
    jnp.bfloat16 explicitly even for small C (f32 matmul is multi-pass there).
    """
    c4, out_c = weight_t.shape
    C = c4 // 4
    if matmul_dtype is None:
        matmul_dtype = jnp.bfloat16 if C >= 128 else jnp.float32
    w32 = weight_t.astype(jnp.float32)
    wg = gamma.astype(jnp.float32)[:, None] * w32
    # PyTorch 4C order is [x0, x1, x2, x3]; the kernel sees [x0|x2] (even
    # image row) and [x1|x3] (odd image row).  LN stats are order invariant.
    w_ev = jnp.concatenate([wg[0:C], wg[2 * C:3 * C]], axis=0).astype(matmul_dtype)
    w_od = jnp.concatenate([wg[C:2 * C], wg[3 * C:4 * C]], axis=0).astype(matmul_dtype)
    bias = (beta.astype(jnp.float32) @ w32).reshape(1, out_c)
    return w_ev, w_od, bias


def _cdiv(a, b):
    return -(-a // b)


def _vmem_capacity_bytes():
    try:
        cap = getattr(pltpu.get_tpu_info(), "vmem_capacity_bytes", None)
        if cap:
            return int(cap)
    except Exception:
        pass
    return 64 * 2 ** 20  # conservative default: v7x per-TensorCore VMEM


def _choose_tile(bho, row_bytes, budget_bytes):
    """Rows of the (B*Ho, 2, Wo, 2C) view processed per grid step.

    Largest 8-aligned tile fitting the VMEM byte budget, then rebalanced so
    the grid length is even (>= 2): v7x shards the "parallel" axis across two
    TensorCores, and >= 2 steps keeps one input prefetch in flight elsewhere.
    (8-aligned tile keeps the (tile*Wo, 2C_out) output block sublane-aligned
    for any Wo.)
    """
    if bho <= 8:
        return bho
    t = min(bho, max(8, budget_bytes // max(row_bytes, 1)))
    t = max(8, (t // 8) * 8)
    g = _cdiv(bho, t)
    if g == 1:
        g = 2
    elif g % 2:
        g += 1
    return max(8, min(t, ((_cdiv(bho, g) + 7) // 8) * 8))


def patch_merging_apply(x, H, W, w_ev, w_od, bias):
    """Fused PatchMerging forward with pre-folded weights.

    x: (B, H*W, C), f32 or bf16 (bf16 activations roughly halve HBM traffic;
    LN statistics and matmul accumulation stay f32 in-kernel).
    Returns (B, ceil(H/2)*ceil(W/2), 2C) in x.dtype.
    """
    B, L, C = x.shape
    assert L == H * W, "input feature has wrong size"
    c2 = 2 * C
    out_c = w_ev.shape[-1]

    xh = x.reshape(B, H, W, C)
    pad_h, pad_w = H % 2, W % 2
    if pad_h or pad_w:
        # TODO(synk): odd H/W keeps one XLA zero-pad pass; could be folded
        # into the kernel with edge masking if odd resolutions matter.
        xh = jnp.pad(xh, ((0, 0), (0, pad_h), (0, pad_w), (0, 0)))
    Ho, Wo = (H + pad_h) // 2, (W + pad_w) // 2
    bho = B * Ho
    n_tokens = bho * Wo

    # Free row-major view: entry [p, q, w, :] holds the two horizontally
    # adjacent pixels of one 2x2 cell; q=0 -> [x0|x2], q=1 -> [x1|x3].
    xv = xh.reshape(bho, 2, Wo, c2)

    # Per-generation VMEM budget -> tile size.  ~48 MiB limit on v7x (64 MiB
    # physical, leave compiler headroom), ~96 MiB on v5e/v6e (128 MiB).
    vmem_limit = int(min(_vmem_capacity_bytes() * 3 // 4, 110 * 2 ** 20))
    x_b = jnp.dtype(x.dtype).itemsize
    w_b = jnp.dtype(w_ev.dtype).itemsize
    weight_bytes = 2 * (c2 * out_c) * w_b * 2 + out_c * 4 * 2  # dbl-buffered consts
    row_bytes = Wo * (2 * c2 * x_b * 2        # input block, double-buffered
                      + out_c * x_b * 2       # output block, double-buffered
                      + 2 * c2 * 4 * 2        # f32 working copies (block, centered)
                      + 2 * c2 * w_b          # cast matmul operands / relayout
                      + out_c * 4)            # f32 accumulator
    budget = max(vmem_limit - weight_bytes - 4 * 2 ** 20, 8 * row_bytes)
    tile = _choose_tile(bho, row_bytes, budget)
    rows_per_step = tile * Wo
    grid = (pl.cdiv(bho, tile),)

    # NOTE: for C < 64 the output lane width (2C < 128) forces masked partial
    # stores; accepted knowingly -- production Swin widths (C >= 96) are fine.
    # The non-divisible last grid step reads a partially stale input block,
    # but LN/rsqrt is row-local and the out-of-range output rows are clipped
    # by the pipeline writeback, so valid rows are unaffected.
    out = pl.pallas_call(
        _patch_merging_kernel,
        out_shape=jax.ShapeDtypeStruct((n_tokens, out_c), x.dtype),
        grid=grid,
        in_specs=[
            pl.BlockSpec((tile, 2, Wo, c2), lambda i: (i, 0, 0, 0)),
            pl.BlockSpec((c2, out_c), lambda i: (0, 0)),
            pl.BlockSpec((c2, out_c), lambda i: (0, 0)),
            pl.BlockSpec((1, out_c), lambda i: (0, 0)),
        ],
        out_specs=pl.BlockSpec((rows_per_step, out_c), lambda i: (i, 0)),
        compiler_params=pltpu.CompilerParams(
            dimension_semantics=("parallel",),
            vmem_limit_bytes=vmem_limit,
        ),
    )(xv, w_ev, w_od, bias)

    return out.reshape(B, Ho * Wo, out_c)


def patch_merging(x, H, W, gamma, beta, weight_t, *, matmul_dtype=None):
    """Convenience wrapper (prep + apply).  Prefer preparing params once."""
    params = prepare_patch_merging_params(gamma, beta, weight_t,
                                          matmul_dtype=matmul_dtype)
    return patch_merging_apply(x, H, W, *params)


def _reference(x, H, W, gamma, beta, weight_t):
    """Pure-JAX transcription of the PyTorch module (for verification)."""
    B, L, C = x.shape
    xh = x.reshape(B, H, W, C)
    pad_h, pad_w = H % 2, W % 2
    if pad_h or pad_w:
        xh = jnp.pad(xh, ((0, 0), (0, pad_h), (0, pad_w), (0, 0)))
    x0 = xh[:, 0::2, 0::2, :]
    x1 = xh[:, 1::2, 0::2, :]
    x2 = xh[:, 0::2, 1::2, :]
    x3 = xh[:, 1::2, 1::2, :]
    xm = jnp.concatenate([x0, x1, x2, x3], axis=-1).reshape(B, -1, 4 * C)
    mean = jnp.mean(xm, axis=-1, keepdims=True)
    var = jnp.mean((xm - mean) ** 2, axis=-1, keepdims=True)
    xn = (xm - mean) / jnp.sqrt(var + LN_EPS)
    return (xn * gamma + beta) @ weight_t


if __name__ == "__main__":
    key = jax.random.PRNGKey(0)
    kx, kw, kg, kb, kx2 = jax.random.split(key, 5)

    B, C, H, W = 2, 16, 16, 16            # L = H*W = 256, merged width 2C = 32
    x = jax.random.normal(kx, (B, H * W, C), dtype=jnp.float32)

    # nn.Linear(4C, 2C, bias=False) weight stored transposed as (4C, 2C);
    # nn.LayerNorm(4C) affine.
    bound = 1.0 / (4 * C) ** 0.5
    weight_t = jax.random.uniform(kw, (4 * C, 2 * C), jnp.float32, -bound, bound)
    gamma = 1.0 + 0.1 * jax.random.normal(kg, (4 * C,), dtype=jnp.float32)
    beta = 0.1 * jax.random.normal(kb, (4 * C,), dtype=jnp.float32)

    # Weight prep hoisted out of the per-call path (done once per module).
    params = prepare_patch_merging_params(gamma, beta, weight_t)

    out = jax.block_until_ready(patch_merging_apply(x, H, W, *params))
    ref = _reference(x, H, W, gamma, beta, weight_t)
    assert out.shape == (B, (H // 2) * (W // 2), 2 * C), out.shape
    err = float(jnp.max(jnp.abs(out - ref)))
    assert jnp.allclose(out, ref, atol=2e-4, rtol=2e-3), f"mismatch, max err {err}"

    # Odd spatial size: exercises the zero-pad path, Wo % 8 != 0 (relayout on
    # the cast operand) and the masked non-divisible last grid step.
    H2 = W2 = 13
    x2 = jax.random.normal(kx2, (B, H2 * W2, C), dtype=jnp.float32)
    out2 = jax.block_until_ready(patch_merging_apply(x2, H2, W2, *params))
    ref2 = _reference(x2, H2, W2, gamma, beta, weight_t)
    assert out2.shape == (B, 7 * 7, 2 * C), out2.shape
    err2 = float(jnp.max(jnp.abs(out2 - ref2)))
    assert jnp.allclose(out2, ref2, atol=2e-4, rtol=2e-3), f"mismatch, max err {err2}"

    print("KERNEL_OK")
</pallas_src>

<mosaic_0001>
module attributes {stable_mosaic.version = 11 : i64} {
  func.func @_patch_merging_kernel(%arg0: i32, %arg1: memref<8x2x8x32xf32, #tpu.memory_space<vmem>>, %arg2: memref<32x32xf32, #tpu.memory_space<vmem>>, %arg3: memref<32x32xf32, #tpu.memory_space<vmem>>, %arg4: memref<1x32xf32, #tpu.memory_space<vmem>>, %arg5: memref<64x32xf32, #tpu.memory_space<vmem>>) attributes {dimension_semantics = [#tpu.dimension_semantics<parallel>], iteration_bounds = array<i64: 2>, scalar_prefetch = 0 : i64, scratch_operands = 0 : i64, tpu.core_type = #tpu.core_type<tc>, window_params = [{transform_indices = @transform_0, window_bounds = array<i64: 8, 2, 8, 32>}, {pipeline_mode = #tpu.pipeline_mode<synchronous>, transform_indices = @transform_1, window_bounds = array<i64: 32, 32>}, {pipeline_mode = #tpu.pipeline_mode<synchronous>, transform_indices = @transform_2, window_bounds = array<i64: 32, 32>}, {pipeline_mode = #tpu.pipeline_mode<synchronous>, transform_indices = @transform_3, window_bounds = array<i64: 1, 32>}, {transform_indices = @transform_4, window_bounds = array<i64: 64, 32>}]} {
    %c0 = arith.constant 0 : index
    %c0_0 = arith.constant 0 : index
    %c0_1 = arith.constant 0 : index
    %c0_2 = arith.constant 0 : index
    %0 = vector.load %arg1[%c0, %c0_0, %c0_1, %c0_2] : memref<8x2x8x32xf32, #tpu.memory_space<vmem>>, vector<8x2x8x32xf32>
    %1 = vector.extract_strided_slice %0 {offsets = [0, 0, 0, 0], sizes = [8, 1, 8, 32], strides = [1, 1, 1, 1]} : vector<8x2x8x32xf32> to vector<8x1x8x32xf32>
    %2 = vector.shape_cast %1 : vector<8x1x8x32xf32> to vector<8x8x32xf32>
    %3 = vector.extract_strided_slice %0 {offsets = [0, 1, 0, 0], sizes = [8, 1, 8, 32], strides = [1, 1, 1, 1]} : vector<8x2x8x32xf32> to vector<8x1x8x32xf32>
    %4 = vector.shape_cast %3 : vector<8x1x8x32xf32> to vector<8x8x32xf32>
    %cst = arith.constant dense<0.000000e+00> : vector<8x8xf32>
    %5 = vector.multi_reduction <add>, %2, %cst [2] : vector<8x8x32xf32> to vector<8x8xf32>
    %6 = vector.shape_cast %5 : vector<8x8xf32> to vector<8x8x1xf32>
    %cst_3 = arith.constant dense<0.000000e+00> : vector<8x8xf32>
    %7 = vector.multi_reduction <add>, %4, %cst_3 [2] : vector<8x8x32xf32> to vector<8x8xf32>
    %8 = vector.shape_cast %7 : vector<8x8xf32> to vector<8x8x1xf32>
    %9 = arith.addf %6, %8 : vector<8x8x1xf32>
    %cst_4 = arith.constant 1.562500e-02 : f32
    %10 = vector.broadcast %cst_4 : f32 to vector<8x8x1xf32>
    %11 = arith.mulf %9, %10 : vector<8x8x1xf32>
    %12 = vector.broadcast %11 : vector<8x8x1xf32> to vector<8x8x32xf32>
    %13 = arith.subf %2, %12 : vector<8x8x32xf32>
    %14 = vector.broadcast %11 : vector<8x8x1xf32> to vector<8x8x32xf32>
    %15 = arith.subf %4, %14 : vector<8x8x32xf32>
    %16 = arith.mulf %13, %13 : vector<8x8x32xf32>
    %cst_5 = arith.constant dense<0.000000e+00> : vector<8x8xf32>
    %17 = vector.multi_reduction <add>, %16, %cst_5 [2] : vector<8x8x32xf32> to vector<8x8xf32>
    %18 = vector.shape_cast %17 : vector<8x8xf32> to vector<8x8x1xf32>
    %19 = arith.mulf %15, %15 : vector<8x8x32xf32>
    %cst_6 = arith.constant dense<0.000000e+00> : vector<8x8xf32>
    %20 = vector.multi_reduction <add>, %19, %cst_6 [2] : vector<8x8x32xf32> to vector<8x8xf32>
    %21 = vector.shape_cast %20 : vector<8x8xf32> to vector<8x8x1xf32>
    %22 = arith.addf %18, %21 : vector<8x8x1xf32>
    %cst_7 = arith.constant 1.562500e-02 : f32
    %23 = vector.broadcast %cst_7 : f32 to vector<8x8x1xf32>
    %24 = arith.mulf %22, %23 : vector<8x8x1xf32>
    %cst_8 = arith.constant 9.99999974E-6 : f32
    %25 = vector.broadcast %cst_8 : f32 to vector<8x8x1xf32>
    %26 = arith.addf %24, %25 : vector<8x8x1xf32>
    %27 = math.rsqrt %26 : vector<8x8x1xf32>
    %28 = vector.broadcast %27 : vector<8x8x1xf32> to vector<8x8x32xf32>
    %29 = arith.mulf %13, %28 : vector<8x8x32xf32>
    %30 = vector.shape_cast %29 : vector<8x8x32xf32> to vector<64x32xf32>
    %31 = vector.broadcast %27 : vector<8x8x1xf32> to vector<8x8x32xf32>
    %32 = arith.mulf %15, %31 : vector<8x8x32xf32>
    %33 = vector.shape_cast %32 : vector<8x8x32xf32> to vector<64x32xf32>
    %c0_9 = arith.constant 0 : index
    %c0_10 = arith.constant 0 : index
    %34 = vector.load %arg2[%c0_9, %c0_10] : memref<32x32xf32, #tpu.memory_space<vmem>>, vector<32x32xf32>
    %cst_11 = arith.constant dense<0.000000e+00> : vector<64x32xf32>
    %35 = tpu.matmul %30, %34, %cst_11 {dimension_numbers = #tpu.dot_dimension_numbers<[1], [0], [0], [1], [0, 0, 1, 1], [], []>} : vector<64x32xf32>, vector<32x32xf32>, vector<64x32xf32> -> vector<64x32xf32>
    %c0_12 = arith.constant 0 : index
    %c0_13 = arith.constant 0 : index
    %36 = vector.load %arg3[%c0_12, %c0_13] : memref<32x32xf32, #tpu.memory_space<vmem>>, vector<32x32xf32>
    %cst_14 = arith.constant dense<0.000000e+00> : vector<64x32xf32>
    %37 = tpu.matmul %33, %36, %cst_14 {dimension_numbers = #tpu.dot_dimension_numbers<[1], [0], [0], [1], [0, 0, 1, 1], [], []>} : vector<64x32xf32>, vector<32x32xf32>, vector<64x32xf32> -> vector<64x32xf32>
    %38 = arith.addf %35, %37 : vector<64x32xf32>
    %c0_15 = arith.constant 0 : index
    %c0_16 = arith.constant 0 : index
    %39 = vector.load %arg4[%c0_15, %c0_16] : memref<1x32xf32, #tpu.memory_space<vmem>>, vector<1x32xf32>
    %40 = vector.broadcast %39 : vector<1x32xf32> to vector<64x32xf32>
    %41 = arith.addf %38, %40 : vector<64x32xf32>
    %c0_17 = arith.constant 0 : index
    %c0_18 = arith.constant 0 : index
    %42 = vector.load %arg5[%c0_17, %c0_18] : memref<64x32xf32, #tpu.memory_space<vmem>>, vector<64x32xf32>
    tpu.vector_store %arg5[%c0_17, %c0_18], %41 {strides = array<i32>} : memref<64x32xf32, #tpu.memory_space<vmem>>, vector<64x32xf32>,
    return
  }
  func.func @transform_0(%arg0: i32) -> (i32, i32, i32, i32) {
    %c0_i32 = arith.constant 0 : i32
    %c0_i32_0 = arith.constant 0 : i32
    %c0_i32_1 = arith.constant 0 : i32
    %c0_i32_2 = arith.constant 0 : i32
    return %arg0, %c0_i32, %c0_i32_0, %c0_i32_1 : i32, i32, i32, i32
  }
  func.func @transform_1(%arg0: i32) -> (i32, i32) {
    %c0_i32 = arith.constant 0 : i32
    %c0_i32_0 = arith.constant 0 : i32
    %c0_i32_1 = arith.constant 0 : i32
    return %c0_i32, %c0_i32_0 : i32, i32
  }
  func.func @transform_2(%arg0: i32) -> (i32, i32) {
    %c0_i32 = arith.constant 0 : i32
    %c0_i32_0 = arith.constant 0 : i32
    %c0_i32_1 = arith.constant 0 : i32
    return %c0_i32, %c0_i32_0 : i32, i32
  }
  func.func @transform_3(%arg0: i32) -> (i32, i32) {
    %c0_i32 = arith.constant 0 : i32
    %c0_i32_0 = arith.constant 0 : i32
    %c0_i32_1 = arith.constant 0 : i32
    return %c0_i32, %c0_i32_0 : i32, i32
  }
  func.func @transform_4(%arg0: i32) -> (i32, i32) {
    %c0_i32 = arith.constant 0 : i32
    %c0_i32_0 = arith.constant 0 : i32
    return %arg0, %c0_i32 : i32, i32
  }
}

</mosaic_0001>

<bundles_post_ra>
// kernel: tpu_custom_call.1
= control target key start
LH: loop header
LB: loop body
LE: loop exit
PB: predicated region body
PF: predicated region fallthrough
CT: control target
= control target key end

     0   :  { %9 = vsyncpa [#allocation3], 0  ;;  %s1591_s0 = inlined_call_operand.hbm [shape: f32[16,2,8,32], index: 0, kind: input, shape index: {}]   ;;  %s1592_s1 = inlined_call_operand.hbm [shape: f32[32,32], index: 1, kind: input, shape index: {}]   ;;  %s1593_s2 = inlined_call_operand.hbm [shape: f32[32,32], index: 2, kind: input, shape index: {}]   ;;  %s1594_s3 = inlined_call_operand.vmem [shape: f32[1,32], index: 3, kind: input, shape index: {}]   ;;  %s1595_s4 = inlined_call_operand.vmem [shape: f32[128,32], index: 4, kind: output, shape index: {}]  }
   0x1   :  { %11 = vsyncpa [#allocation3 + $0x1], 0 }
   0x2   :  { %12 = vsyncpa [#allocation5], 0  ;;  %s1193_s15 = smov 0   ;;  %s1195_s16 = smov 0  }
   0x3   :  { %s1197_s17 = smov 0   ;;  %s1199_s18 = smov 0  }
   0x4 LB: > { %s834_s19 = sadd.s32 4294967295, %s1161_s18   ;;  %p38_p0 = scmp.ne.s32.totalorder %s1153_s16, %s1149_s15  ;;  %s1161_s18 = sphi %s1199_s18, %s1611_s18   ;;  %s1157_s17 = sphi %s1197_s17, %s1610_s17   ;;  %s1153_s16 = sphi %s1195_s16, %s1609_s16   ;;  %s1149_s15 = sphi %s1193_s15, %s1608_s15  }
   0x5   : > { %p1215_p1 = scmp.eq.s32.totalorder %s834_s19, 0  ;;  %p836_p2 = scmp.ge.s32.totalorder %s1161_s18, 1 }
   0x6   : > { %p138_p3 = scmp.lt.s32.totalorder %s1161_s18, 3  ;;  %s1163_s23 = smov [#allocation4]  }
   0x7   : > { %s1600_s20 = scalar_select %p1215_p1, 1, 0 }
   0x8   : > { %p1223_p4 = por %p1215_p1, %p38_p0  ;;  %p1227_p5 = pnand %p836_p2, %p138_p3 }
   0x9   : > { %s150_s24 = sshll.u32 %s1163_s23, 4  ;;  %s1164_s26 = smov [#allocation6]   ;;  %s151_s24 = int_to_ptr.vmem [resolvable:$true] %s150_s24 }
   0xa   : > { %s1601_s21 = scalar_select %p1223_p4, 1, 0 }
   0xb   : > { %s1602_s22 = scalar_select %p1227_p5, 1, 0 }
   0xc   : > { %p969_p6 = pneg %p1227_p5  ;;  %s163_s27 = sshll.u32 %s1164_s26, 4  ;;  %s1239_s27 = int_to_ptr.vmem [resolvable:$true] %s163_s27 }
   0xd   : > { %s1037_s30 = scalar_lea.hbm %s1592_s1, 512 }
   0xe   : > { %p1235_p7 = pnand %p969_p6, %p1215_p1  ;;  %p1038_p8 = scmp.ne.s32.totalorder %s1592_s1, %s1037_s30 }
   0xf   : > { %p1044_p12 = scmp.lt.u32.totalorder %s1037_s30, %s1592_s1 }
  0x10   : > { %p1039_p9 = pneg %p1235_p7 }
  0x12   : > { %p1040_p10 = pnand %p1039_p9, %p1038_p8 }
  0x14   : > { %p1041_p11 = pneg %p1040_p10 }
  0x16   : > { %p1046_p13 = pnand %p1044_p12, %p1041_p11 }
  0x18   : > { %1049 = shalt.err (!%p1046_p13)
}
  0x19   : > { %s1050_s9 = scalar_lea.vmem %s151_s24, 512  ;;  %p1058_p6 = scmp.lt.s32.totalorder %s151_s24, %s151_s24 }
  0x1a   : > { %p1051_p0 = scmp.ne.s32.totalorder %s151_s24, %s1050_s9  ;;  %p1059_p1 = scmp.lt.s32.totalorder %s1050_s9, %s1050_s9 }
  0x1c   : > { %p1053_p2 = pnand %p1051_p0, %p1039_p9  ;;  %p1060_p4 = por %p1059_p1, %p1058_p6 }
  0x1e   : > { %p1054_p3 = pneg %p1053_p2 }
  0x20   : > { %p1061_p5 = pnand %p1060_p4, %p1054_p3 }
  0x22   : > { %1064 = shalt.err (!%p1061_p5)
}
  0x23   : > { %s1165_s10 = smov 128   ;;  %s1166_s11 = smov 8  }
  0x24   : > { %972 = dma.hbm_to_vmem [thread:$0]  (!%p1235_p7), %s1592_s1, 512, %s151_s24, [#allocation5], %s1165_s10, %s1165_s10, %s1166_s11  }
  0x25   : > { %s1065_s23 = scalar_lea.hbm %s1593_s2, 512 }
  0x26   : > { %p1066_p1 = scmp.ne.s32.totalorder %s1593_s2, %s1065_s23  ;;  %p1072_p8 = scmp.lt.u32.totalorder %s1065_s23, %s1593_s2 }
  0x28   : > { %p1068_p4 = pnand %p1066_p1, %p1039_p9 }
  0x2a   : > { %p1069_p5 = pneg %p1068_p4 }
  0x2c   : > { %p1074_p10 = pnand %p1072_p8, %p1069_p5 }
  0x2e   : > { %1077 = shalt.err (!%p1074_p10)
}
  0x2f   : > { %s1078_s24 = scalar_lea.vmem %s1239_s27, 512  ;;  %p1086_p0 = scmp.lt.s32.totalorder %s1239_s27, %s1239_s27 }
  0x30   : > { %p1079_p11 = scmp.ne.s32.totalorder %s1239_s27, %s1078_s24  ;;  %p1087_p2 = scmp.lt.s32.totalorder %s1078_s24, %s1078_s24 }
  0x32   : > { %p1081_p12 = pnand %p1079_p11, %p1039_p9  ;;  %p1088_p3 = por %p1087_p2, %p1086_p0 }
  0x34   : > { %p1082_p13 = pneg %p1081_p12 }
  0x36   : > { %p1089_p6 = pnand %p1088_p3, %p1082_p13 }
  0x38   : > { %1092 = shalt.err (!%p1089_p6)
}
  0x39   : > { %975 = dma.hbm_to_vmem [thread:$0]  (!%p1235_p7), %s1593_s2, 512, %s1239_s27, [#allocation5], %s1165_s10, %s1165_s10, %s1166_s11  }
  0x3a   : > { %s1295_s7 = sadd.s32 1, %s1161_s18   ;;  %s25_s25 = sadd.s32 1, %s1157_s17 }
  0x3b   : > { %s22_s8 = ssub.s32 %s1161_s18, %s1295_s7  ;;  %p32_p9 = scmp.ne.s32.totalorder %s1157_s17, %s1153_s16 }
  0x3c   : > { %p23_p1 = scmp.eq.s32.totalorder %s22_s8, 0  ;;  %p33_p4 = scmp.eq.s32.totalorder %s1161_s18, 0 }
  0x3d   : > { %p982_p5 = scmp.lt.s32.totalorder %s1161_s18, 2  ;;  %s180_s9 = sand.u32 1, %s1157_s17  }
  0x3e   : > { %s1306_s12 = scalar_select %p23_p1, %s1157_s17, %s25_s25  }
  0x3f   : > { %p34_p8 = por %p33_p4, %p32_p9  ;;  %s840_s13 = sshll.u32 %s180_s9, 7 }
  0x40   : > { %s870_s14 = sshll.u32 %s1161_s18, 11  ;;  %s184_s27 = scalar_lea.vmem [#allocation2], %s840_s13 }
  0x41   : > { %s1312_s26 = scalar_lea.hbm %s1591_s0, %s870_s14  ;;  %s192_s28 = sshll.u32 %s184_s27, 4  ;;  %s1318_s28 = int_to_ptr.vmem [resolvable:$true] %s192_s28 }
  0x42   : > { %p1314_p7 = pnand %p982_p5, %p34_p8  ;;  %s1320_s30 = scalar_lea.sflag [#allocation3], %s180_s9 }
  0x43   : > { %s1093_s24 = scalar_lea.hbm %s1312_s26, 2048  ;;  %s1098_s25 = scalar_lea.hbm %s1591_s0, 4096 }
  0x44   : > { %p1094_p10 = scmp.ne.s32.totalorder %s1312_s26, %s1093_s24  ;;  %p1095_p11 = pneg %p1314_p7 }
  0x45   : > { %p1099_p0 = scmp.lt.u32.totalorder %s1312_s26, %s1591_s0  ;;  %p1100_p2 = scmp.lt.u32.totalorder %s1098_s25, %s1093_s24 }
  0x46   : > { %p1096_p12 = pnand %p1095_p11, %p1094_p10  ;;  %p1102_p6 = scmp.lt.u32.totalorder %s1093_s24, %s1312_s26 }
  0x47   : > { %p1101_p3 = por %p1100_p2, %p1099_p0 }
  0x48   : > { %p1097_p13 = pneg %p1096_p12 }
  0x49   : > { %p1103_p9 = por %p1102_p6, %p1101_p3 }
  0x4b   : > { %p1104_p1 = pnand %p1103_p9, %p1097_p13 }
  0x4d   : > { %1107 = shalt.err (!%p1104_p1)
}
  0x4e   : > { %s1108_s9 = scalar_lea.vmem %s1318_s28, 2048  ;;  %s1167_s14 = smov [#allocation2]  }
  0x4f   : > { %p1109_p4 = scmp.ne.s32.totalorder %s1318_s28, %s1108_s9  ;;  %s1113_s15 = sshll.u32 %s1167_s14, 4  ;;  %s1114_s15 = int_to_ptr.vmem [resolvable:$false] %s1113_s15 }
  0x50   : > { %s1115_s23 = scalar_lea.vmem %s1114_s15, 4096  ;;  %p1116_p10 = scmp.lt.s32.totalorder %s1318_s28, %s1114_s15 }
  0x51   : > { %p1111_p5 = pnand %p1109_p4, %p1095_p11  ;;  %p1117_p12 = scmp.lt.s32.totalorder %s1115_s23, %s1108_s9 }
  0x53   : > { %p1112_p8 = pneg %p1111_p5  ;;  %p1118_p0 = por %p1117_p12, %p1116_p10 }
  0x55   : > { %p1119_p2 = pnand %p1118_p0, %p1112_p8 }
  0x57   : > { %1122 = shalt.err (!%p1119_p2)
}
  0x58   : > { %979 = dma.hbm_to_vmem [thread:$0]  (!%p1314_p7), %s1312_s26, 2048, %s1318_s28, %s1320_s30, %s1165_s10, %s1165_s10, %s1166_s11  }
  0x59   : > { %p1605_p11 = scmp.ne.s32.totalorder %s1602_s22, 0 }
  0x5a   : > { %s206_s27 = sand.u32 (!%p1605_p11), 1, %s1153_s16   ;;  %p1606_p13 = scmp.ne.s32.totalorder (!%p1605_p11), %s1601_s21, 0 }
  0x5b   : > { %204 = sbr.rel (%p1605_p11) target bundleno = 666 (0x29a), region = 36  ;;  %s845_s24 = sshll.u32 (!%p1605_p11), %s206_s27, 7 }
  0x5c   : > { %s207_s5 = scalar_lea.sflag (!%p1605_p11), [#allocation3], %s206_s27  ;;  %s1354_s6 = scalar_lea.vmem (!%p1605_p11), [#allocation2], %s845_s24 }
  0x62   : > { %1140 = dma.done.wait (%p1606_p13), %s207_s5, 2048  }
  0x63   : > { %1142 = vsyncadd (%p1606_p13), %s207_s5, 4294965248  ;;  %p1607_p3 = scmp.ne.s32.totalorder %s1600_s20, 0 }
  0x65   : > { %1144 = dma.done.wait (%p1607_p3), [#allocation5], 1024  }
  0x66   : > { %1146 = vsyncadd (%p1607_p3), [#allocation5], 4294966272  ;;  %vm266_vm0 = vcmask 261120   ;;  %v252_v0 = vld [vmem:[%s1354_s6 + $0x10] sm:$0xff]  ;;  %v250_v1 = vld [vmem:[%s1354_s6] sm:$0xff]  ;;  %s848_s20 = sshll.u32 %s834_s19, 3 }
  0x67   : > { %v253_v2 = vld [vmem:[%s1354_s6 + $0x18] sm:$0xff]  ;;  %v270_v3 = vsel %vm266_vm0, %v252_v0, 0.0  ;;  %v267_v4 = vsel %vm266_vm0, %v250_v1, 0.0  ;;  %v251_v5 = vld [vmem:[%s1354_s6 + $0x8] sm:$0xff]  ;;  %v254_v9 = vld [vmem:[%s1354_s6 + $0x20] sm:$0xff]  ;;  %p245_p7 = scmp.lt.s32.totalorder %s848_s20, 15 }
  0x68   : > { %271 = vadd.xlane.f32.xlu1 %v270_v3  ;;  %268 = vadd.xlane.f32.xlu0 %v267_v4  ;;  %v294_v6 = vsel %vm266_vm0, %v253_v2, 0.0  ;;  %v291_v7 = vsel %vm266_vm0, %v251_v5, 0.0  ;;  %v1373_v8 = vld [vmem:[%s1354_s6 + $0x28] sm:$0xff]  ;;  %v273_v11 = vsel %vm266_vm0, %v254_v9, 0.0  ;;  %v1380_v12 = vld [vmem:[%s1354_s6 + $0x38] sm:$0xff]  ;;  %v1383_v13 = vld [vmem:[%s1354_s6 + $0x30] sm:$0xff] }
  0x69   : > { %v297_v10 = vsel %vm266_vm0, %v1373_v8, 0.0  ;;  %v300_v14 = vsel %vm266_vm0, %v1380_v12, 0.0  ;;  %v276_v15 = vsel %vm266_vm0, %v1383_v13, 0.0  ;;  %v1390_v16 = vld [vmem:[%s1354_s6 + $0x48] sm:$0xff]  ;;  %v1393_v17 = vld [vmem:[%s1354_s6 + $0x40] sm:$0xff]  ;;  %v1400_v20 = vld [vmem:[%s1354_s6 + $0x58] sm:$0xff] }
  0x6a   : > { %v303_v18 = vsel %vm266_vm0, %v1390_v16, 0.0  ;;  %v279_v19 = vsel %vm266_vm0, %v1393_v17, 0.0  ;;  %v1403_v21 = vld [vmem:[%s1354_s6 + $0x50] sm:$0xff]  ;;  %v306_v22 = vsel %vm266_vm0, %v1400_v20, 0.0  ;;  %v1410_v24 = vld [vmem:[%s1354_s6 + $0x68] sm:$0xff]  ;;  %v1413_v25 = vld [vmem:[%s1354_s6 + $0x60] sm:$0xff] }
  0x6b   : > { %v282_v23 = vsel %vm266_vm0, %v1403_v21, 0.0  ;;  %v309_v26 = vsel %vm266_vm0, %v1410_v24, 0.0  ;;  %v285_v27 = vsel %vm266_vm0, %v1413_v25, 0.0  ;;  %v1420_v28 = vld [vmem:[%s1354_s6 + $0x78] sm:$0xff]  ;;  %v1423_v29 = vld [vmem:[%s1354_s6 + $0x70] sm:$0xff]  ;;  %s1613_s20 = smov (!%p245_p7, %s848_s20), 15 }
  0x6c   : > { %295 = vadd.xlane.f32.xlu1 %v294_v6  ;;  %292 = vadd.xlane.f32.xlu0 %v291_v7  ;;  %v312_v30 = vsel %vm266_vm0, %v1420_v28, 0.0  ;;  %v288_v31 = vsel %vm266_vm0, %v1423_v29, 0.0  ;;  %s849_s21 = sshll.u32 %s1613_s20, 3 }
  0x6d   : > { %s1560_s28 = scalar_lea.vmem %s1595_s4, %s849_s21 }
  0x70   : > { %298 = vadd.xlane.f32.xlu1 %v297_v10  ;;  %274 = vadd.xlane.f32.xlu0 %v273_v11 }
  0x74   : > { %301 = vadd.xlane.f32.xlu1 %v300_v14  ;;  %277 = vadd.xlane.f32.xlu0 %v276_v15 }
  0x78   : > { %304 = vadd.xlane.f32.xlu1 %v303_v18  ;;  %280 = vadd.xlane.f32.xlu0 %v279_v19 }
  0x7c   : > { %307 = vadd.xlane.f32.xlu1 %v306_v22  ;;  %283 = vadd.xlane.f32.xlu0 %v282_v23 }
  0x80   : > { %310 = vadd.xlane.f32.xlu1 %v309_v26  ;;  %286 = vadd.xlane.f32.xlu0 %v285_v27 }
  0x84   : > { %313 = vadd.xlane.f32.xlu1 %v312_v30  ;;  %289 = vadd.xlane.f32.xlu0 %v288_v31 }
  0xf5   : > { %v272_v32 = vpop.xlane.xlu1 %271  ;;  %v269_v33 = vpop.xlane.xlu0 %268 }
  0xf9   : > { %v296_v34 = vpop.xlane.xlu1 %295  ;;  %v293_v35 = vpop.xlane.xlu0 %292 }
  0xfa   : > { %v316_v36 = vadd.f32 %v296_v34, %v272_v32  ;;  %v315_v37 = vadd.f32 %v293_v35, %v269_v33 }
  0xfc   : > { %v324_v38 = vmul.f32 0.015625, %v316_v36  ;;  %v323_v39 = vmul.f32 0.015625, %v315_v37 }
  0xfd   : > { %v299_v40 = vpop.xlane.xlu1 %298  ;;  %v275_v41 = vpop.xlane.xlu0 %274 }
  0xfe   : > { %v1429_v42 = vsub.f32 %v252_v0, %v324_v38  ;;  %v1431_v43 = vsub.f32 %v253_v2, %v324_v38  ;;  %v1433_v44 = vsub.f32 %v250_v1, %v323_v39  ;;  %v1435_v45 = vsub.f32 %v251_v5, %v323_v39 }
  0xff   : > { %v317_v46 = vadd.f32 %v299_v40, %v275_v41 }
 0x100   : > { %v379_v47 = vmul.f32 %v1435_v45, %v1435_v45  ;;  %v347_v48 = vmul.f32 %v1433_v44, %v1433_v44  ;;  %v380_v52 = vmul.f32 %v1431_v43, %v1431_v43  ;;  %v348_v56 = vmul.f32 %v1429_v42, %v1429_v42 }
 0x101   : > { %v325_v49 = vmul.f32 0.015625, %v317_v46  ;;  %v302_v50 = vpop.xlane.xlu1 %301  ;;  %v278_v51 = vpop.xlane.xlu0 %277 }
 0x102   : > { %v387_v53 = vsel %vm266_vm0, %v379_v47, 0.0  ;;  %v355_v54 = vsel %vm266_vm0, %v347_v48, 0.0  ;;  %v318_v55 = vadd.f32 %v302_v50, %v278_v51  ;;  %v390_v60 = vsel %vm266_vm0, %v380_v52, 0.0 }
 0x103   : > { %v1447_v57 = vsub.f32 %v254_v9, %v325_v49  ;;  %v1450_v58 = vsub.f32 %v1373_v8, %v325_v49  ;;  %388 = vadd.xlane.f32.xlu1 %v387_v53  ;;  %356 = vadd.xlane.f32.xlu0 %v355_v54  ;;  %v358_v3 = vsel %vm266_vm0, %v348_v56, 0.0  ;;  %v464_v53 = vld [vmem:[#allocation6 + $0x8] sm:$0xff]  ;;  %v459_v54 = vld [vmem:[#allocation4] sm:$0xff] }
 0x104   : > { %v326_v59 = vmul.f32 0.015625, %v318_v55  ;;  %v460_v56 = vld [vmem:[#allocation4 + $0x8] sm:$0xff] }
 0x105   : > { %v305_v61 = vpop.xlane.xlu1 %304  ;;  %v281_v62 = vpop.xlane.xlu0 %280  ;;  %v381_v63 = vmul.f32 %v1450_v58, %v1450_v58  ;;  %v349_v0 = vmul.f32 %v1447_v57, %v1447_v57 }
 0x106   : > { %v1458_v1 = vsub.f32 %v1383_v13, %v326_v59  ;;  %v1461_v2 = vsub.f32 %v1380_v12, %v326_v59  ;;  %v319_v4 = vadd.f32 %v305_v61, %v281_v62  ;;  %v943_v59 = vpack.c.bf16 %v460_v56, %v459_v54  ;;  %v466_v61 = vld [vmem:[#allocation6 + $0x18] sm:$0xff]  ;;  %v461_v62 = vld [vmem:[#allocation4 + $0x10] sm:$0xff] }
 0x107   : > { %391 = vadd.xlane.f32.xlu1 %v390_v60  ;;  %359 = vadd.xlane.f32.xlu0 %v358_v3  ;;  %v393_v5 = vsel %vm266_vm0, %v381_v63, 0.0  ;;  %v361_v7 = vsel %vm266_vm0, %v349_v0, 0.0  ;;  %v465_v60 = vld [vmem:[#allocation6 + $0x10] sm:$0xff]  ;;  %v462_v0 = vld [vmem:[#allocation4 + $0x18] sm:$0xff] }
 0x108   : > { %v327_v6 = vmul.f32 0.015625, %v319_v4  ;;  %v382_v8 = vmul.f32 %v1461_v2, %v1461_v2  ;;  %v350_v9 = vmul.f32 %v1458_v1, %v1458_v1  ;;  %944 = vmatprep.subr.bf16.mxu0 %v943_v59  ;;  %v939_v63 = vpack.c.bf16 %v466_v61, %v465_v60 }
 0x109   : > { %v308_v10 = vpop.xlane.xlu1 %307  ;;  %v284_v11 = vpop.xlane.xlu0 %283  ;;  %946 = vmatpush3.bf16.msra.mxu0 %v943_v59  ;;  %v947_v3 = vpack.c.bf16 %v462_v0, %v461_v62 }
 0x10a   : > { %v1471_v12 = vsub.f32 %v1393_v17, %v327_v6  ;;  %v1474_v13 = vsub.f32 %v1390_v16, %v327_v6  ;;  %v320_v14 = vadd.f32 %v308_v10, %v284_v11  ;;  %v396_v15 = vsel %vm266_vm0, %v382_v8, 0.0 }
 0x10b   : > { %394 = vadd.xlane.f32.xlu1 %v393_v5  ;;  %362 = vadd.xlane.f32.xlu0 %v361_v7  ;;  %v364_v19 = vsel %vm266_vm0, %v350_v9, 0.0 }
 0x10c   : > { %v328_v18 = vmul.f32 0.015625, %v320_v14  ;;  %v383_v22 = vmul.f32 %v1474_v13, %v1474_v13  ;;  %v351_v23 = vmul.f32 %v1471_v12, %v1471_v12  ;;  %948 = vmatprep.subr.bf16.mxu0 %v947_v3 }
 0x10d   : > { %v311_v26 = vpop.xlane.xlu1 %310  ;;  %v287_v17 = vpop.xlane.xlu0 %286  ;;  %950 = vmatpush3.bf16.msra.mxu0 %v947_v3 }
 0x10e   : > { %v1483_v27 = vsub.f32 %v1403_v21, %v328_v18  ;;  %v1486_v16 = vsub.f32 %v1400_v20, %v328_v18  ;;  %v321_v30 = vadd.f32 %v311_v26, %v287_v17  ;;  %v399_v31 = vsel %vm266_vm0, %v383_v22, 0.0 }
 0x10f   : > { %397 = vadd.xlane.f32.xlu1 %v396_v15  ;;  %365 = vadd.xlane.f32.xlu0 %v364_v19  ;;  %v367_v33 = vsel %vm266_vm0, %v351_v23, 0.0 }
 0x110   : > { %v329_v32 = vmul.f32 0.015625, %v321_v30  ;;  %v384_v34 = vmul.f32 %v1486_v16, %v1486_v16  ;;  %v352_v35 = vmul.f32 %v1483_v27, %v1483_v27 }
 0x111   : > { %v314_v36 = vpop.xlane.xlu1 %313  ;;  %v290_v21 = vpop.xlane.xlu0 %289 }
 0x112   : > { %v1495_v37 = vsub.f32 %v1413_v25, %v329_v32  ;;  %v1498_v20 = vsub.f32 %v1410_v24, %v329_v32  ;;  %v322_v38 = vadd.f32 %v314_v36, %v290_v21  ;;  %v402_v39 = vsel %vm266_vm0, %v384_v34, 0.0 }
 0x113   : > { %400 = vadd.xlane.f32.xlu1 %v399_v31  ;;  %368 = vadd.xlane.f32.xlu0 %v367_v33  ;;  %v370_v41 = vsel %vm266_vm0, %v352_v35, 0.0 }
 0x114   : > { %v330_v40 = vmul.f32 0.015625, %v322_v38  ;;  %v385_v46 = vmul.f32 %v1498_v20, %v1498_v20  ;;  %v353_v47 = vmul.f32 %v1495_v37, %v1495_v37 }
 0x116   : > { %v1507_v25 = vsub.f32 %v1423_v29, %v330_v40  ;;  %v1510_v24 = vsub.f32 %v1420_v28, %v330_v40  ;;  %v405_v48 = vsel %vm266_vm0, %v385_v46, 0.0  ;;  %v373_v49 = vsel %vm266_vm0, %v353_v47, 0.0  ;;  %v463_v28 = vld [vmem:[#allocation6] sm:$0xff] }
 0x117   : > { %403 = vadd.xlane.f32.xlu1 %v402_v39  ;;  %371 = vadd.xlane.f32.xlu0 %v370_v41  ;;  %v935_v55 = vpack.c.bf16 %v464_v53, %v463_v28 }
 0x118   : > { %v386_v50 = vmul.f32 %v1510_v24, %v1510_v24  ;;  %v354_v51 = vmul.f32 %v1507_v25, %v1507_v25 }
 0x119   : > { %936 = vmatprep.subr.bf16.mxu1 %v935_v55 }
 0x11a   : > { %v408_v29 = vsel %vm266_vm0, %v386_v50, 0.0  ;;  %v376_v52 = vsel %vm266_vm0, %v354_v51, 0.0  ;;  %938 = vmatpush3.bf16.msra.mxu1 %v935_v55 }
 0x11b   : > { %406 = vadd.xlane.f32.xlu1 %v405_v48  ;;  %374 = vadd.xlane.f32.xlu0 %v373_v49 }
 0x11c   : > { %940 = vmatprep.subr.bf16.mxu1 %v939_v63 }
 0x11e   : > { %942 = vmatpush3.bf16.msra.mxu1 %v939_v63 }
 0x11f   : > { %409 = vadd.xlane.f32.xlu1 %v408_v29  ;;  %377 = vadd.xlane.f32.xlu0 %v376_v52 }
 0x190   : > { %v389_v4 = vpop.xlane.xlu1 %388  ;;  %v357_v5 = vpop.xlane.xlu0 %356 }
 0x191   : > { %v411_v6 = vadd.f32 %v389_v4, %v357_v5 }
 0x193   : > { %v419_v7 = vmul.f32 0.015625, %v411_v6 }
 0x194   : > { %v392_v8 = vpop.xlane.xlu1 %391  ;;  %v360_v9 = vpop.xlane.xlu0 %359 }
 0x195   : > { %v427_v10 = vadd.f32 1e-05, %v419_v7  ;;  %v412_v11 = vadd.f32 %v392_v8, %v360_v9 }
 0x197   : > { %1021 = vrsqrt.f32 %v427_v10  ;;  %v420_v14 = vmul.f32 0.015625, %v412_v11 }
 0x198   : > { %v395_v15 = vpop.xlane.xlu1 %394  ;;  %v363_v18 = vpop.xlane.xlu0 %362 }
 0x199   : > { %v428_v19 = vadd.f32 1e-05, %v420_v14  ;;  %v413_v22 = vadd.f32 %v395_v15, %v363_v18 }
 0x19b   : > { %1023 = vrsqrt.f32 %v428_v19  ;;  %v421_v23 = vmul.f32 0.015625, %v413_v22 }
 0x19c   : > { %v398_v26 = vpop.xlane.xlu1 %397  ;;  %v366_v17 = vpop.xlane.xlu0 %365 }
 0x19d   : > { %v429_v30 = vadd.f32 1e-05, %v421_v23  ;;  %v414_v31 = vadd.f32 %v398_v26, %v366_v17 }
 0x19f   : > { %1025 = vrsqrt.f32 %v429_v30  ;;  %v422_v32 = vmul.f32 0.015625, %v414_v31 }
 0x1a0   : > { %v401_v33 = vpop.xlane.xlu1 %400  ;;  %v369_v34 = vpop.xlane.xlu0 %368 }
 0x1a1   : > { %v1022_v35 = vpop.eup %1021  ;;  %v430_v36 = vadd.f32 1e-05, %v422_v32  ;;  %v415_v21 = vadd.f32 %v401_v33, %v369_v34 }
 0x1a2   : > { %v451_v38 = vmul.f32 %v1022_v35, %v1435_v45  ;;  %v443_v39 = vmul.f32 %v1022_v35, %v1433_v44 }
 0x1a3   : > { %1027 = vrsqrt.f32 %v430_v36  ;;  %v423_v40 = vmul.f32 0.015625, %v415_v21 }
 0x1a4   : > { %v404_v41 = vpop.xlane.xlu1 %403  ;;  %903 = vmatprep.mubr.msk.f32.mxu1 %vm266_vm0, %v451_v38  ;;  %923 = vmatprep.mubr.msk.f32.mxu0 %vm266_vm0, %v443_v39  ;;  %v372_v46 = vpop.xlane.xlu0 %371 }
 0x1a5   : > { %v1024_v47 = vpop.eup %1023  ;;  %v431_v48 = vadd.f32 1e-05, %v423_v40  ;;  %v416_v49 = vadd.f32 %v404_v41, %v372_v46 }
 0x1a6   : > { %v452_v50 = vmul.f32 %v1024_v47, %v1431_v43  ;;  %v444_v51 = vmul.f32 %v1024_v47, %v1429_v42 }
 0x1a7   : > { %1029 = vrsqrt.f32 %v431_v48  ;;  %v424_v29 = vmul.f32 0.015625, %v416_v49 }
 0x1a8   : > { %v407_v45 = vpop.xlane.xlu1 %406  ;;  %904 = vmatmul.mubr.msk.f32.vlgmr.msra.gmra.mrb[0].mxu1 %vm266_vm0, %v452_v50  ;;  %924 = vmatmul.mubr.msk.f32.vlgmr.msra.gmra.mrb[0].mxu0 %vm266_vm0, %v444_v51  ;;  %v375_v44 = vpop.xlane.xlu0 %374 }
 0x1a9   : > { %v1026_v52 = vpop.eup %1025  ;;  %v432_v28 = vadd.f32 1e-05, %v424_v29  ;;  %v417_v53 = vadd.f32 %v407_v45, %v375_v44 }
 0x1aa   : > { %v453_v54 = vmul.f32 %v1026_v52, %v1450_v58  ;;  %v445_v55 = vmul.f32 %v1026_v52, %v1447_v57 }
 0x1ab   : > { %1031 = vrsqrt.f32 %v432_v28  ;;  %v425_v56 = vmul.f32 0.015625, %v417_v53 }
 0x1ac   : > { %v410_v43 = vpop.xlane.xlu1 %409  ;;  %906 = vmatprep.mubr.msk.f32.mxu1 %vm266_vm0, %v453_v54  ;;  %926 = vmatprep.mubr.msk.f32.mxu0 %vm266_vm0, %v445_v55  ;;  %v378_v42 = vpop.xlane.xlu0 %377 }
 0x1ad   : > { %v1028_v59 = vpop.eup %1027  ;;  %v433_v60 = vadd.f32 1e-05, %v425_v56  ;;  %v418_v61 = vadd.f32 %v410_v43, %v378_v42 }
 0x1ae   : > { %v454_v62 = vmul.f32 %v1028_v59, %v1461_v2  ;;  %v446_v63 = vmul.f32 %v1028_v59, %v1458_v1 }
 0x1af   : > { %1033 = vrsqrt.f32 %v433_v60  ;;  %v426_v0 = vmul.f32 0.015625, %v418_v61 }
 0x1b0   : > { %907 = vmatmul.mubr.msk.f32.gmra.mrb[2].mxu1 %vm266_vm0, %v454_v62  ;;  %927 = vmatmul.mubr.msk.f32.gmra.mrb[2].mxu0 %vm266_vm0, %v446_v63 }
 0x1b1   : > { %v1030_v57 = vpop.eup %1029  ;;  %v434_v58 = vadd.f32 1e-05, %v426_v0 }
 0x1b2   : > { %v455_v3 = vmul.f32 %v1030_v57, %v1474_v13  ;;  %v447_v4 = vmul.f32 %v1030_v57, %v1471_v12 }
 0x1b3   : > { %1035 = vrsqrt.f32 %v434_v58 }
 0x1b4   : > { %909 = vmatprep.mubr.msk.f32.mxu1 %vm266_vm0, %v455_v3  ;;  %929 = vmatprep.mubr.msk.f32.mxu0 %vm266_vm0, %v447_v4 }
 0x1b5   : > { %v1032_v2 = vpop.eup %1031 }
 0x1b6   : > { %v456_v1 = vmul.f32 %v1032_v2, %v1486_v16  ;;  %v448_v5 = vmul.f32 %v1032_v2, %v1483_v27 }
 0x1b8   : > { %910 = vmatmul.mubr.msk.f32.gmra.mrb[4].mxu1 %vm266_vm0, %v456_v1  ;;  %930 = vmatmul.mubr.msk.f32.gmra.mrb[4].mxu0 %vm266_vm0, %v448_v5 }
 0x1b9   : > { %v1034_v6 = vpop.eup %1033 }
 0x1ba   : > { %v457_v13 = vmul.f32 %v1034_v6, %v1498_v20  ;;  %v449_v12 = vmul.f32 %v1034_v6, %v1495_v37  ;;  %v866_v20 = vld [vmem:[%s1594_s3] ss:$0 sm:$0xff] }
 0x1bc   : > { %912 = vmatprep.mubr.msk.f32.mxu1 %vm266_vm0, %v457_v13  ;;  %932 = vmatprep.mubr.msk.f32.mxu0 %vm266_vm0, %v449_v12 }
 0x1bd   : > { %v1036_v7 = vpop.eup %1035 }
 0x1be   : > { %v458_v8 = vmul.f32 %v1036_v7, %v1510_v24  ;;  %v450_v16 = vmul.f32 %v1036_v7, %v1507_v25 }
 0x1c0   : > { %913 = vmatmul.mubr.msk.f32.gmra.mrb[6].mxu1 %vm266_vm0, %v458_v8  ;;  %933 = vmatmul.mubr.msk.f32.gmra.mrb[6].mxu0 %vm266_vm0, %v450_v16 }
 0x27b   : > { %v905_v27 = vpop.f32.mrb[0].mxu1  ;;  %v925_v37 = vpop.f32.mrb[0].mxu0 }
 0x27c   : > { %v692_v9 = vadd.f32 %v925_v37, %v905_v27  ;;  %v557_v10 = vpop.f32.mrb[1].mxu1  ;;  %v686_v24 = vpop.f32.mrb[1].mxu0 }
 0x27d   : > { %v687_v25 = vadd.f32 %v686_v24, %v557_v10 }
 0x27e   : > { %v733_v11 = vadd.f32 %v866_v20, %v692_v9 }
 0x27f   : > { %v732_v14 = vadd.f32 %v866_v20, %v687_v25 }
 0x280   : > { %741 = vst.msk [vmem:[%s1560_s28 + $0x8] sm:$0xff] %vm266_vm0, %v733_v11 }
 0x281   : > { %740 = vst.msk [vmem:[%s1560_s28] sm:$0xff] %vm266_vm0, %v732_v14 }
 0x283   : > { %v908_v15 = vpop.f32.mrb[2].mxu1  ;;  %v928_v18 = vpop.f32.mrb[2].mxu0 }
 0x284   : > { %v702_v19 = vadd.f32 %v928_v18, %v908_v15  ;;  %v567_v22 = vpop.f32.mrb[3].mxu1  ;;  %v696_v23 = vpop.f32.mrb[3].mxu0 }
 0x285   : > { %v697_v26 = vadd.f32 %v696_v23, %v567_v22 }
 0x286   : > { %v735_v17 = vadd.f32 %v866_v20, %v702_v19 }
 0x287   : > { %v734_v30 = vadd.f32 %v866_v20, %v697_v26 }
 0x288   : > { %743 = vst.msk [vmem:[%s1560_s28 + $0x18] sm:$0xff] %vm266_vm0, %v735_v17 }
 0x289   : > { %742 = vst.msk [vmem:[%s1560_s28 + $0x10] sm:$0xff] %vm266_vm0, %v734_v30 }
 0x28b   : > { %v911_v31 = vpop.f32.mrb[4].mxu1  ;;  %v931_v32 = vpop.f32.mrb[4].mxu0 }
 0x28c   : > { %v712_v33 = vadd.f32 %v931_v32, %v911_v31  ;;  %v577_v34 = vpop.f32.mrb[5].mxu1  ;;  %v706_v35 = vpop.f32.mrb[5].mxu0 }
 0x28d   : > { %v707_v36 = vadd.f32 %v706_v35, %v577_v34 }
 0x28e   : > { %v737_v21 = vadd.f32 %v866_v20, %v712_v33 }
 0x28f   : > { %v736_v38 = vadd.f32 %v866_v20, %v707_v36 }
 0x290   : > { %745 = vst.msk [vmem:[%s1560_s28 + $0x28] sm:$0xff] %vm266_vm0, %v737_v21 }
 0x291   : > { %744 = vst.msk [vmem:[%s1560_s28 + $0x20] sm:$0xff] %vm266_vm0, %v736_v38 }
 0x293   : > { %v914_v39 = vpop.f32.mrb[6].mxu1  ;;  %v934_v40 = vpop.f32.mrb[6].mxu0 }
 0x294   : > { %v722_v41 = vadd.f32 %v934_v40, %v914_v39  ;;  %v587_v46 = vpop.f32.mrb[7].mxu1  ;;  %v716_v47 = vpop.f32.mrb[7].mxu0 }
 0x295   : > { %v717_v48 = vadd.f32 %v716_v47, %v587_v46 }
 0x296   : > { %v739_v49 = vadd.f32 %v866_v20, %v722_v41 }
 0x297   : > { %v738_v50 = vadd.f32 %v866_v20, %v717_v48 }
 0x298   : > { %747 = vst.msk [vmem:[%s1560_s28 + $0x38] sm:$0xff] %vm266_vm0, %v739_v49 }
 0x299   : > { %746 = vst.msk [vmem:[%s1560_s28 + $0x30] sm:$0xff] %vm266_vm0, %v738_v50 }
 0x29a PF: > { %p15_p6 = scmp.ge.s32.totalorder %s1295_s7, 4   ;;  %s1608_s15 = smov %s1153_s16 }
 0x29b   : > { %s1609_s16 = smov %s1157_s17  ;;  %s1610_s17 = smov %s1306_s12 }
 0x29c   : > { %s1611_s18 = smov %s1295_s7  ;;  %17 = sbr.rel (!%p15_p6) target bundleno = 4 (0x4), region = 84 }
 0x2a3   :  { %770 = vsyncpa [#allocation3], 1 }
 0x2a4   :  { %772 = vsyncpa [#allocation3 + $0x1], 1 }
 0x2a5   :  { %773 = vsyncpa [#allocation5], 1 }

</bundles_post_ra>
